<compile_context>
chip_gen: v5e
topology: v5e:2x2
jax: 0.10.0
libtpu: 0.0.40
codegen_flags: <defaults>
</compile_context>

<pallas_src>
import jax
import jax.numpy as jnp
from jax.experimental import pallas as pl
from jax.experimental.pallas import tpu as pltpu

INPUT_DIM = 42
HIDDEN_DIM = 200
OUTPUT_DIM = 1

TB_MAX = 1024  # batch rows per tile (multiple of 128 and 8; ~0.7 MiB/tile in VMEM)


def _round_up(n, m):
    return ((n + m - 1) // m) * m


def mlp_kernel(x_ref, w1_ref, b1_ref, w2_ref, b2_ref, o_ref):
    # fc1 on the MXU: (TB, IN) @ (IN, HID), f32 accumulate.
    h = jnp.dot(x_ref[...], w1_ref[...], preferred_element_type=jnp.float32)
    # bias + ReLU on the VPU (kept in f32 -> fine on v5e's no-bf16 VPU too).
    h = jnp.maximum(h + b1_ref[...], 0.0)
    # fc2 with OUTPUT_DIM == 1: VPU multiply by the single weight row + lane
    # reduction, keeping the MXU free for the next tile's fc1 matmul.
    col = jnp.sum(h * w2_ref[...], axis=-1, keepdims=True)          # (TB, 1)
    # Relayout the column to a lane-dense (1, TB) row (cheap XLU work) so the
    # output store / HBM writeback is unmasked and dense.
    row = jnp.transpose(col, (1, 0)) + b2_ref[...]                   # (1, TB)
    o_ref[...] = row.astype(o_ref.dtype)


def feedforward_forward(x, w1, b1, w2, b2, *, tb_max=TB_MAX, matmul_dtype=None):
    """x: (B, INPUT_DIM) f32 -> (B, OUTPUT_DIM) f32.

    matmul_dtype: optionally jnp.bfloat16 to halve the HBM traffic of the
    x / w1 stream on v6e/v7x (accumulation stays f32). Default None = exact f32.
    """
    B = x.shape[0]

    # Tile size: single full tile for small batches (rounded up to a sublane
    # multiple), otherwise TB_MAX-row tiles (multiple of 128 for aligned
    # lane-dense output blocks).
    if B <= tb_max:
        tb = _round_up(max(B, 8), 8)
    else:
        tb = tb_max
    num_tiles = pl.cdiv(B, tb)
    b_pad = num_tiles * tb

    if b_pad != B:
        # Pad the batch; padded rows are computed but sliced off below.
        x = jnp.pad(x, ((0, b_pad - B), (0, 0)))

    if matmul_dtype is not None:
        x = x.astype(matmul_dtype)
        w1 = w1.astype(matmul_dtype)

    # fc2 weight as a (1, HID) row for the in-kernel VPU multiply.
    w2_row = w2.reshape(1, HIDDEN_DIM).astype(jnp.float32)
    b2_2d = b2.reshape(1, OUTPUT_DIM).astype(jnp.float32)

    grid_spec = pltpu.PrefetchScalarGridSpec(
        num_scalar_prefetch=0,
        grid=(num_tiles,),
        in_specs=[
            # x: streamed batch tiles (double-buffered by the Pallas pipeline).
            pl.BlockSpec((tb, INPUT_DIM), lambda i: (i, 0)),
            # Weights / biases: constant index_map -> fetched once, VMEM-resident.
            pl.BlockSpec((INPUT_DIM, HIDDEN_DIM), lambda i: (0, 0)),
            pl.BlockSpec((1, HIDDEN_DIM), lambda i: (0, 0)),
            pl.BlockSpec((1, HIDDEN_DIM), lambda i: (0, 0)),
            pl.BlockSpec((1, OUTPUT_DIM), lambda i: (0, 0)),
        ],
        # Lane-dense output: one (1, TB) row per grid step into a (1, B_pad) slab.
        out_specs=pl.BlockSpec((1, tb), lambda i: (0, i)),
    )

    out_row = pl.pallas_call(
        mlp_kernel,
        out_shape=jax.ShapeDtypeStruct((1, b_pad), jnp.float32),
        grid_spec=grid_spec,
        compiler_params=pltpu.CompilerParams(
            # Batch tiles are independent: lets v7x shard the grid across its
            # two TensorCores (no-op on single-TC v5e/v6e).
            dimension_semantics=("parallel",),
            # Explicit scoped-VMEM budget (well above the ~3 MiB this kernel
            # needs; safe on v5e's 16 MiB default and v7x's 64 MiB physical).
            vmem_limit_bytes=32 * 1024 * 1024,
        ),
    )(x, w1, b1, w2_row, b2_2d)

    # Layout plumbing back to the PyTorch (B, 1) shape; drop padded rows.
    return out_row[0, :B].reshape(B, OUTPUT_DIM)


def init_params(key):
    """Deterministic init mirroring nn.Linear shapes (stored transposed)."""
    k1, k2, k3, k4 = jax.random.split(key, 4)
    # PyTorch default: U(-1/sqrt(fan_in), 1/sqrt(fan_in))
    lim1 = 1.0 / jnp.sqrt(jnp.float32(INPUT_DIM))
    lim2 = 1.0 / jnp.sqrt(jnp.float32(HIDDEN_DIM))
    w1 = jax.random.uniform(k1, (INPUT_DIM, HIDDEN_DIM), jnp.float32, -lim1, lim1)
    b1 = jax.random.uniform(k2, (1, HIDDEN_DIM), jnp.float32, -lim1, lim1)
    w2 = jax.random.uniform(k3, (HIDDEN_DIM, OUTPUT_DIM), jnp.float32, -lim2, lim2)
    b2 = jax.random.uniform(k4, (1, OUTPUT_DIM), jnp.float32, -lim2, lim2)
    return w1, b1, w2, b2


if __name__ == "__main__":
    key = jax.random.PRNGKey(0)
    kx, kp, kx2 = jax.random.split(key, 3)

    w1, b1, w2, b2 = init_params(kp)

    # Small example (single tile).
    batch = 8
    x = jax.random.normal(kx, (batch, INPUT_DIM), dtype=jnp.float32)
    out = feedforward_forward(x, w1, b1, w2, b2)
    jax.block_until_ready(out)

    ref = jnp.maximum(x @ w1 + b1, 0.0) @ w2 + b2
    assert out.shape == (batch, OUTPUT_DIM)
    assert jnp.allclose(out, ref, atol=1e-5, rtol=1e-5)

    # Larger batch that is not a multiple of the tile size: exercises the
    # pipelined multi-tile grid path and the final-tile padding.
    batch2 = 2000
    x2 = jax.random.normal(kx2, (batch2, INPUT_DIM), dtype=jnp.float32)
    out2 = feedforward_forward(x2, w1, b1, w2, b2)
    jax.block_until_ready(out2)

    ref2 = jnp.maximum(x2 @ w1 + b1, 0.0) @ w2 + b2
    assert out2.shape == (batch2, OUTPUT_DIM)
    assert jnp.allclose(out2, ref2, atol=1e-4, rtol=1e-5)

    print("KERNEL_OK")
</pallas_src>

<mosaic_0001>
module attributes {stable_mosaic.version = 11 : i64} {
  func.func @mlp_kernel(%arg0: i32, %arg1: memref<8x42xf32, #tpu.memory_space<vmem>>, %arg2: memref<42x200xf32, #tpu.memory_space<vmem>>, %arg3: memref<1x200xf32, #tpu.memory_space<vmem>>, %arg4: memref<1x200xf32, #tpu.memory_space<vmem>>, %arg5: memref<1x1xf32, #tpu.memory_space<vmem>>, %arg6: memref<1x8xf32, #tpu.memory_space<vmem>>) attributes {dimension_semantics = [#tpu.dimension_semantics<parallel>], iteration_bounds = array<i64: 1>, scalar_prefetch = 0 : i64, scratch_operands = 0 : i64, tpu.core_type = #tpu.core_type<tc>, window_params = [{transform_indices = @transform_0, window_bounds = array<i64: 8, 42>}, {pipeline_mode = #tpu.pipeline_mode<synchronous>, transform_indices = @transform_1, window_bounds = array<i64: 42, 200>}, {pipeline_mode = #tpu.pipeline_mode<synchronous>, transform_indices = @transform_2, window_bounds = array<i64: 1, 200>}, {pipeline_mode = #tpu.pipeline_mode<synchronous>, transform_indices = @transform_3, window_bounds = array<i64: 1, 200>}, {pipeline_mode = #tpu.pipeline_mode<synchronous>, transform_indices = @transform_4, window_bounds = array<i64: 1, 1>}, {transform_indices = @transform_5, window_bounds = array<i64: 1, 8>}]} {
    %c0 = arith.constant 0 : index
    %c0_0 = arith.constant 0 : index
    %0 = vector.load %arg1[%c0, %c0_0] : memref<8x42xf32, #tpu.memory_space<vmem>>, vector<8x42xf32>
    %c0_1 = arith.constant 0 : index
    %c0_2 = arith.constant 0 : index
    %1 = vector.load %arg2[%c0_1, %c0_2] : memref<42x200xf32, #tpu.memory_space<vmem>>, vector<42x200xf32>
    %cst = arith.constant dense<0.000000e+00> : vector<8x200xf32>
    %2 = tpu.matmul %0, %1, %cst {dimension_numbers = #tpu.dot_dimension_numbers<[1], [0], [0], [1], [0, 0, 1, 1], [], []>} : vector<8x42xf32>, vector<42x200xf32>, vector<8x200xf32> -> vector<8x200xf32>
    %c0_3 = arith.constant 0 : index
    %c0_4 = arith.constant 0 : index
    %3 = vector.load %arg3[%c0_3, %c0_4] : memref<1x200xf32, #tpu.memory_space<vmem>>, vector<1x200xf32>
    %4 = vector.broadcast %3 : vector<1x200xf32> to vector<8x200xf32>
    %5 = arith.addf %2, %4 : vector<8x200xf32>
    %cst_5 = arith.constant 0.000000e+00 : f32
    %6 = vector.broadcast %cst_5 : f32 to vector<8x200xf32>
    %7 = arith.maximumf %5, %6 : vector<8x200xf32>
    %c0_6 = arith.constant 0 : index
    %c0_7 = arith.constant 0 : index
    %8 = vector.load %arg4[%c0_6, %c0_7] : memref<1x200xf32, #tpu.memory_space<vmem>>, vector<1x200xf32>
    %9 = vector.broadcast %8 : vector<1x200xf32> to vector<8x200xf32>
    %10 = arith.mulf %7, %9 : vector<8x200xf32>
    %cst_8 = arith.constant dense<0.000000e+00> : vector<8xf32>
    %11 = vector.multi_reduction <add>, %10, %cst_8 [1] : vector<8x200xf32> to vector<8xf32>
    %12 = vector.shape_cast %11 : vector<8xf32> to vector<8x1xf32>
    %13 = tpu.transpose %12, [1, 0] : vector<8x1xf32> -> vector<1x8xf32>
    %c0_9 = arith.constant 0 : index
    %c0_10 = arith.constant 0 : index
    %14 = vector.load %arg5[%c0_9, %c0_10] : memref<1x1xf32, #tpu.memory_space<vmem>>, vector<1x1xf32>
    %15 = vector.broadcast %14 : vector<1x1xf32> to vector<1x8xf32>
    %16 = arith.addf %13, %15 : vector<1x8xf32>
    %c0_11 = arith.constant 0 : index
    %c0_12 = arith.constant 0 : index
    %17 = vector.load %arg6[%c0_11, %c0_12] : memref<1x8xf32, #tpu.memory_space<vmem>>, vector<1x8xf32>
    tpu.vector_store %arg6[%c0_11, %c0_12], %16 {strides = array<i32>} : memref<1x8xf32, #tpu.memory_space<vmem>>, vector<1x8xf32>,
    return
  }
  func.func @transform_0(%arg0: i32) -> (i32, i32) {
    %c0_i32 = arith.constant 0 : i32
    %c0_i32_0 = arith.constant 0 : i32
    return %arg0, %c0_i32 : i32, i32
  }
  func.func @transform_1(%arg0: i32) -> (i32, i32) {
    %c0_i32 = arith.constant 0 : i32
    %c0_i32_0 = arith.constant 0 : i32
    %c0_i32_1 = arith.constant 0 : i32
    return %c0_i32, %c0_i32_0 : i32, i32
  }
  func.func @transform_2(%arg0: i32) -> (i32, i32) {
    %c0_i32 = arith.constant 0 : i32
    %c0_i32_0 = arith.constant 0 : i32
    %c0_i32_1 = arith.constant 0 : i32
    return %c0_i32, %c0_i32_0 : i32, i32
  }
  func.func @transform_3(%arg0: i32) -> (i32, i32) {
    %c0_i32 = arith.constant 0 : i32
    %c0_i32_0 = arith.constant 0 : i32
    %c0_i32_1 = arith.constant 0 : i32
    return %c0_i32, %c0_i32_0 : i32, i32
  }
  func.func @transform_4(%arg0: i32) -> (i32, i32) {
    %c0_i32 = arith.constant 0 : i32
    %c0_i32_0 = arith.constant 0 : i32
    %c0_i32_1 = arith.constant 0 : i32
    return %c0_i32, %c0_i32_0 : i32, i32
  }
  func.func @transform_5(%arg0: i32) -> (i32, i32) {
    %c0_i32 = arith.constant 0 : i32
    %c0_i32_0 = arith.constant 0 : i32
    return %c0_i32, %arg0 : i32, i32
  }
}

</mosaic_0001>

<bundles_post_ra>
// kernel: tpu_custom_call.1
= control target key start
LH: loop header
LB: loop body
LE: loop exit
PB: predicated region body
PF: predicated region fallthrough
CT: control target
= control target key end

     0   :  { %s343_s0 = inlined_call_operand.hbm [shape: f32[8,42], index: 0, kind: input, shape index: {}]   ;;  %s344_s1 = inlined_call_operand.hbm [shape: f32[42,200], index: 1, kind: input, shape index: {}]   ;;  %s345_s2 = inlined_call_operand.vmem [shape: f32[1,200], index: 2, kind: input, shape index: {}]   ;;  %s346_s3 = inlined_call_operand.vmem [shape: f32[1,200], index: 3, kind: input, shape index: {}]   ;;  %s347_s4 = inlined_call_operand.<no memory space> [shape: f32[1,1], index: 4, kind: input, shape index: {}]   ;;  %s348_s5 = inlined_call_operand.hbm [shape: f32[1,8], index: 5, kind: output, shape index: {}]  }
   0x1   :  { %v10_v0 = vstv %s347_s4 }
   0x2   :  { %11 = vst [vmem:[#allocation2] sm:$0x1] %v10_v0 }
   0x3   :  { %12 = vsyncpa [#allocation4], 0 }
   0x4   :  { %13 = vsyncpa [#allocation7], 0 }
   0x5   :  { %14 = vsyncpa [#allocation5], 0  ;;  %s20_s22 = sshll.u32 %s343_s0, 4  ;;  %s289_s23 = smov [#allocation3]   ;;  %s21_s22 = int_to_ptr.hbm [resolvable:$true] %s20_s22 }
   0x6   :  { %s22_s24 = sshll.u32 %s289_s23, 4  ;;  %s30_s27 = sshll.u32 %s344_s1, 4  ;;  %s23_s24 = int_to_ptr.vmem [resolvable:$true] %s22_s24  ;;  %s31_s27 = int_to_ptr.hbm [resolvable:$true] %s30_s27 }
   0x7   :  { %25 = dma.hbm_to_vmem [thread:$0]  %s21_s22, 128, %s23_s24, [#allocation4]  }
   0x8   :  { %s290_s28 = smov [#allocation6]   ;;  %s291_s29 = smov 256  }
   0x9   :  { %s32_s4 = sshll.u32 %s290_s28, 4  ;;  %s292_s30 = smov 16   ;;  %s33_s4 = int_to_ptr.vmem [resolvable:$true] %s32_s4 }
   0xa   :  { %38 = dma.hbm_to_vmem [thread:$0]  %s31_s27, 1536, %s33_s4, [#allocation7], %s291_s29, %s291_s29, %s292_s30  }
   0xb   :  { %283 = dma.done.wait [#allocation4], 128  }
   0xc   :  { %284 = vsyncadd [#allocation4], 4294967168 }
   0xd   :  { %285 = dma.done.wait [#allocation7], 1536  }
   0xe   :  { %286 = vsyncadd [#allocation7], 4294965760  ;;  %vm76_vm0 = vcmask 1041408   ;;  %v65_v1 = vld [vmem:[#allocation6 + $0x58] sm:$0x3]  ;;  %v63_v3 = vld [vmem:[#allocation6 + $0x48] sm:$0xff] }
   0xf   :  { %v64_v2 = vld [vmem:[#allocation6 + $0x50] sm:$0x3]  ;;  %200 = vmatpush.msk.msra.mxu1 %vm76_vm0, %v65_v1  ;;  %v62_v4 = vld [vmem:[#allocation6 + $0x40] sm:$0xff]  ;;  %v61_v5 = vld [vmem:[#allocation6 + $0x38] sm:$0xff]  ;;  %vm72_vm1 = vcmask 343040   ;;  %vm133_vm2 = vcmask 588800  }
  0x10   :  { %198 = vmatpush.msk.msra.mxu0 %vm76_vm0, %v64_v2  ;;  %v60_v6 = vld [vmem:[#allocation6 + $0x30] sm:$0xff]  ;;  %v59_v7 = vld [vmem:[#allocation6 + $0x28] sm:$0xff]  ;;  %v58_v8 = vld [vmem:[#allocation6 + $0x20] sm:$0xff]  ;;  %v293_v31 = vmov 0   ;;  %s187_s10 = sshll.u32 %s348_s5, 4  ;;  %vm178_vm3 = vcmask 57344   ;;  %s188_s10 = int_to_ptr.hbm [resolvable:$true] %s187_s10 }
  0x11   :  { %114 = vmatpush.msra.mxu1 %v63_v3  ;;  %v57_v9 = vld [vmem:[#allocation6 + $0x18] sm:$0xff]  ;;  %v56_v10 = vld [vmem:[#allocation6 + $0x10] sm:$0xff]  ;;  %v55_v11 = vld [vmem:[#allocation6 + $0x8] sm:$0xff]  ;;  %209 = vset.pattern.permute.xlu1 %v293_v31 }
  0x12   :  { %94 = vmatpush.msra.mxu0 %v62_v4  ;;  %v54_v12 = vld [vmem:[#allocation6] sm:$0xff]  ;;  %v53_v13 = vld [vmem:[#allocation3] sm:$0xff]  ;;  %v170_v30 = vld [vmem:[#allocation2] sm:$0x1] }
  0x13   :  { %115 = vmatpush.msra.mxu1 %v61_v5  ;;  %v66_v14 = vld [vmem:[%s345_s2] sm:$0x3]  ;;  %173 = vperm.xlu1 %209, %v170_v30   ;;  %s294_s2 = smov [#allocation8]  }
  0x14   :  { %95 = vmatpush.msra.mxu0 %v60_v6  ;;  %v69_v15 = vperm.slane %v66_v14, 1  ;;  %v68_v16 = vperm.slane %v66_v14, 0  ;;  %v125_v17 = vld [vmem:[%s346_s3] sm:$0x3]  ;;  %s185_s3 = sshll.u32 %s294_s2, 4  ;;  %s186_s3 = int_to_ptr.vmem [resolvable:$true] %s185_s3 }
  0x15   :  { %116 = vmatpush.msra.mxu1 %v59_v7  ;;  %v127_v22 = vperm.slane %v125_v17, 0  ;;  %v128_v23 = vperm.slane %v125_v17, 1 }
  0x16   :  { %96 = vmatpush.msra.mxu0 %v58_v8 }
  0x17   :  { %117 = vmatpush.msra.mxu1 %v57_v9 }
  0x18   :  { %97 = vmatpush.msra.mxu0 %v56_v10 }
  0x19   :  { %118 = vmatpush.msra.mxu1 %v55_v11 }
  0x1a   :  { %98 = vmatpush.msra.mxu0 %v54_v12  ;;  %201 = vmatmul.msk.f32.vlgmr.msra.gmra.mxu1 %vm72_vm1, %v53_v13 }
  0x1b   :  { %199 = vmatmul.msk.f32.vlgmr.msra.gmra.mxu0 %vm72_vm1, %v53_v13 }
  0x85   :  { %v174_v33 = vpop.permute.xlu1 %173 }
  0x86   :  { %v176_v34 = vperm.slane %v174_v33, 0 }
  0x97   :  { %v120_v18 = vpop.f32.mrf.mxu1 }
  0x98   :  { %v100_v19 = vpop.f32.mrf.mxu0  ;;  %v121_v20 = vadd.f32 %v120_v18, %v69_v15 }
  0x99   :  { %v101_v21 = vadd.f32 %v100_v19, %v68_v16 }
  0x9a   :  { %v124_v24 = vmax.f32 %v121_v20, 0.0 }
  0x9b   :  { %v123_v25 = vmax.f32 %v101_v21, 0.0 }
  0x9c   :  { %v132_v27 = vmul.f32 %v128_v23, %v124_v24 }
  0x9d   :  { %v131_v26 = vmul.f32 %v127_v22, %v123_v25 }
  0x9e   :  { %v134_v28 = vsel %vm133_vm2, %v132_v27, 0.0 }
  0x9f   :  { %v135_v29 = vadd.f32 %v134_v28, %v131_v26 }
  0xa1   :  { %136 = vadd.xlane.f32.xlu0 %v135_v29 }
 0x114   :  { %v137_v32 = vpop.xlane.xlu0 %136 }
 0x115   :  { %138 = vxpose.xlu0.b32.start.end [1/1] (short) (narrow) %v137_v32, 8 }
 0x17c   :  { %210 = vset.pattern.permute.xlu0 %v293_v31 }
 0x1b9   :  { %v154_v35 = vpop.trf.xlu0 }
 0x1ba   :  { %v177_v36 = vadd.f32 %v176_v34, %v154_v35 }
 0x1bc   :  { %179 = vst.msk [vmem:[#allocation8] sm:$0x1] %vm178_vm3, %v177_v36 }
 0x1bd   :  { %190 = dma.vmem_to_hbm [thread:$0]  %s186_s3, 16, %s188_s10, [#allocation5]  }
 0x1be   :  { %287 = dma.done.wait [#allocation5], 16  }
 0x1bf   :  { %288 = vsyncadd [#allocation5], 4294967280 }
 0x1c0   :  { %195 = vsyncpa [#allocation4], 1 }
 0x1c1   :  { %196 = vsyncpa [#allocation7], 1 }
 0x1c2   :  { %197 = vsyncpa [#allocation5], 1 }

</bundles_post_ra>
